<compile_context>
chip_gen: v6e
topology: v6e:2x2x1
jax: 0.10.0
libtpu: 0.0.40
codegen_flags: <defaults>
</compile_context>

<pallas_src>
import functools
import math

import jax
import jax.numpy as jnp
from jax.experimental import pallas as pl
from jax.experimental.pallas import tpu as pltpu


# ----------------------------- Pallas kernel ---------------------------------

def fused_transformer_layers_kernel(
    x_ref,                     # (S, Dp)  f32   input activations (read at layer 0)
    wq_ref, bq_ref,            # (1, Dp, HK) bf16, (1, 1, HK) f32
    wk_ref, bk_ref,
    wv_ref, bv_ref,
    wo_ref, bo_ref,            # (1, HK, Dp) bf16, (1, 1, Dp) f32
    w1_ref, b1_ref,            # (1, Dp, Fp) bf16, (1, 1, Fp) f32
    w2_ref, b2_ref,            # (1, Fp, Dp) bf16, (1, 1, Dp) f32
    o_ref,                     # (S, Dp) f32 — residual stream, resident across layers
    *, num_heads: int, key_size: int,
):
    H, K = num_heads, key_size
    HK = H * K
    S, _ = o_ref.shape
    scale = 1.0 / math.sqrt(key_size)
    bf16 = jnp.bfloat16
    f32 = jnp.float32

    # Layer 0 for this batch element: seed the VMEM-resident residual stream.
    @pl.when(pl.program_id(1) == 0)
    def _init():
        o_ref[...] = x_ref[...].astype(f32)

    x = o_ref[...]                                     # (S, Dp) f32
    xb = x.astype(bf16)

    # ---- q/k/v projections: one lane-dense 2-D matmul each -----------------
    q2 = jnp.dot(xb, wq_ref[0], preferred_element_type=f32) + bq_ref[0]   # (S, HK)
    k2 = jnp.dot(xb, wk_ref[0], preferred_element_type=f32) + bk_ref[0]
    v2 = jnp.dot(xb, wv_ref[0], preferred_element_type=f32) + bv_ref[0]

    # Split heads only for the score / context einsums.
    q3 = jnp.transpose(q2.reshape(S, H, K), (1, 0, 2))                    # (H, S, K)
    k3 = jnp.transpose(k2.reshape(S, H, K), (1, 0, 2))
    v3 = jnp.transpose(v2.reshape(S, H, K), (1, 0, 2))

    s = jnp.einsum('hqk,htk->hqt', q3.astype(bf16), k3.astype(bf16),
                   preferred_element_type=f32) * scale                    # (H, S, S)

    # f32 softmax; divide moved to the EUP via approximate reciprocal.
    s = s - jnp.max(s, axis=-1, keepdims=True)
    e = jnp.exp(s)
    p = e * pl.reciprocal(jnp.sum(e, axis=-1, keepdims=True), approx=True)

    ctx = jnp.einsum('hqt,htk->hqk', p.astype(bf16), v3.astype(bf16),
                     preferred_element_type=f32)                          # (H, S, K)
    ctx2 = jnp.transpose(ctx, (1, 0, 2)).reshape(S, HK)                   # (S, HK)

    attn = jnp.dot(ctx2.astype(bf16), wo_ref[0],
                   preferred_element_type=f32) + bo_ref[0]                # (S, Dp)
    x = x + attn                                                          # residual 1

    # ---- MLP (ReLU) ---------------------------------------------------------
    h1 = jnp.dot(x.astype(bf16), w1_ref[0],
                 preferred_element_type=f32) + b1_ref[0]                  # (S, Fp)
    h1 = jnp.maximum(h1, 0.0)
    mlp = jnp.dot(h1.astype(bf16), w2_ref[0],
                  preferred_element_type=f32) + b2_ref[0]                 # (S, Dp)

    o_ref[...] = x + mlp                                                  # residual 2


# ----------------------------- wrapper ---------------------------------------

def _round_up(n, m):
    return ((n + m - 1) // m) * m


def _pad_to(a, axis, target):
    pad = target - a.shape[axis]
    if pad == 0:
        return a
    widths = [(0, 0)] * a.ndim
    widths[axis] = (0, pad)
    return jnp.pad(a, widths)


def transformer_forward_pallas(x, layer_params, *, num_heads, key_size):
    """Runs the full transformer stack in a single Pallas kernel."""
    B, S, D = x.shape
    H, K = num_heads, key_size
    HK = H * K
    L = len(layer_params)
    F = layer_params[0]["w1"].shape[1]
    Dp = _round_up(D, 128)          # lane-dense model dim
    Fp = _round_up(F, 128)          # lane-dense MLP hidden dim

    assert S % 8 == 0, "sequence length must be a multiple of 8 (sublane tile)"
    assert layer_params[0]["wq"].shape == (D, HK)

    # Pack one layer: 2-D lane-dense projection weights, padded model / hidden dims
    # (zero padding is exact), bf16 weights, f32 biases.
    def pack(p):
        wq = _pad_to(p["wq"], 0, Dp).astype(jnp.bfloat16)                 # (Dp, HK)
        wk = _pad_to(p["wk"], 0, Dp).astype(jnp.bfloat16)
        wv = _pad_to(p["wv"], 0, Dp).astype(jnp.bfloat16)
        wo = _pad_to(p["wo"], 1, Dp).astype(jnp.bfloat16)                 # (HK, Dp)
        bq = p["bq"].reshape(1, HK).astype(jnp.float32)
        bk = p["bk"].reshape(1, HK).astype(jnp.float32)
        bv = p["bv"].reshape(1, HK).astype(jnp.float32)
        bo = _pad_to(p["bo"].reshape(1, D), 1, Dp).astype(jnp.float32)
        w1 = _pad_to(_pad_to(p["w1"], 0, Dp), 1, Fp).astype(jnp.bfloat16)
        b1 = _pad_to(p["b1"].reshape(1, F), 1, Fp).astype(jnp.float32)
        w2 = _pad_to(_pad_to(p["w2"], 0, Fp), 1, Dp).astype(jnp.bfloat16)
        b2 = _pad_to(p["b2"].reshape(1, D), 1, Dp).astype(jnp.float32)
        return (wq, bq, wk, bk, wv, bv, wo, bo, w1, b1, w2, b2)

    packed = [pack(p) for p in layer_params]
    stacked = [jnp.stack([packed[l][i] for l in range(L)], axis=0)
               for i in range(12)]

    x_flat = _pad_to(x.reshape(B * S, D).astype(jnp.float32), 1, Dp)      # (B*S, Dp)

    # Activations: one (S, Dp) block per batch element, constant across the layer
    # axis (residual stream resident in VMEM). Per-layer weights are streamed
    # (double-buffered) along the inner "arbitrary" layer axis.
    act_spec = pl.BlockSpec((S, Dp), lambda b, l: (b, 0))
    in_specs = [act_spec]
    for arr in stacked:
        blk = (1,) + arr.shape[1:]
        in_specs.append(pl.BlockSpec(blk, lambda b, l: (l, 0, 0)))

    kernel = functools.partial(
        fused_transformer_layers_kernel, num_heads=H, key_size=K)

    out = pl.pallas_call(
        kernel,
        out_shape=jax.ShapeDtypeStruct((B * S, Dp), jnp.float32),
        grid=(B, L),
        in_specs=in_specs,
        out_specs=act_spec,
        compiler_params=pltpu.CompilerParams(
            dimension_semantics=("parallel", "arbitrary"),
            vmem_limit_bytes=32 * 1024 * 1024,
        ),
    )(x_flat, *stacked)

    return out[:, :D].reshape(B, S, D)


# ----------------------------- references (plain JAX) ------------------------

def reference_f32(x, all_layer_params, *, num_heads, key_size):
    """Pure f32 semantics of the original PyTorch module."""
    H, K = num_heads, key_size
    scale = 1.0 / math.sqrt(K)
    for p in all_layer_params:
        B, S, D = x.shape
        q = (x @ p["wq"] + p["bq"]).reshape(B, S, H, K)
        k = (x @ p["wk"] + p["bk"]).reshape(B, S, H, K)
        v = (x @ p["wv"] + p["bv"]).reshape(B, S, H, K)
        s = jnp.einsum("bqhc,bthc->bhqt", q * scale, k)
        w = jax.nn.softmax(s, axis=-1)
        o = jnp.einsum("bhqt,bthc->bqhc", w, v).reshape(B, S, H * K)
        x = x + (o @ p["wo"] + p["bo"])
        h1 = jnp.maximum(x @ p["w1"] + p["b1"], 0.0)
        x = x + (h1 @ p["w2"] + p["b2"])
    return x


def reference_mixed(x, all_layer_params, *, num_heads, key_size):
    """Mirror of the kernel's numerics: bf16 matmul operands, f32 accumulation."""
    H, K = num_heads, key_size
    scale = 1.0 / math.sqrt(K)
    bf16 = jnp.bfloat16
    f32 = jnp.float32
    for p in all_layer_params:
        B, S, D = x.shape
        xb = x.reshape(B * S, D).astype(bf16)
        q = jnp.dot(xb, p["wq"].astype(bf16), preferred_element_type=f32) + p["bq"]
        k = jnp.dot(xb, p["wk"].astype(bf16), preferred_element_type=f32) + p["bk"]
        v = jnp.dot(xb, p["wv"].astype(bf16), preferred_element_type=f32) + p["bv"]
        q = q.reshape(B, S, H, K)
        k = k.reshape(B, S, H, K)
        v = v.reshape(B, S, H, K)
        s = jnp.einsum("bqhc,bthc->bhqt", q.astype(bf16), k.astype(bf16),
                       preferred_element_type=f32) * scale
        w = jax.nn.softmax(s, axis=-1)
        ctx = jnp.einsum("bhqt,bthc->bqhc", w.astype(bf16), v.astype(bf16),
                         preferred_element_type=f32).reshape(B * S, H * K)
        attn = jnp.dot(ctx.astype(bf16), p["wo"].astype(bf16),
                       preferred_element_type=f32) + p["bo"]
        x = x + attn.reshape(B, S, D)
        h1 = jnp.dot(x.reshape(B * S, D).astype(bf16), p["w1"].astype(bf16),
                     preferred_element_type=f32) + p["b1"]
        h1 = jnp.maximum(h1, 0.0)
        mlp = jnp.dot(h1.astype(bf16), p["w2"].astype(bf16),
                      preferred_element_type=f32) + p["b2"]
        x = x + mlp.reshape(B, S, D)
    return x


# ----------------------------- parameter init --------------------------------

def init_params(key, *, num_layers, d_model, num_heads, key_size, mlp_hidden):
    hk = num_heads * key_size
    layers = []
    for l in range(num_layers):
        keys = jax.random.split(jax.random.fold_in(key, l), 12)
        s = 0.05
        layers.append({
            "wq": s * jax.random.normal(keys[0], (d_model, hk), jnp.float32),
            "bq": s * jax.random.normal(keys[1], (1, hk), jnp.float32),
            "wk": s * jax.random.normal(keys[2], (d_model, hk), jnp.float32),
            "bk": s * jax.random.normal(keys[3], (1, hk), jnp.float32),
            "wv": s * jax.random.normal(keys[4], (d_model, hk), jnp.float32),
            "bv": s * jax.random.normal(keys[5], (1, hk), jnp.float32),
            "wo": s * jax.random.normal(keys[6], (hk, d_model), jnp.float32),
            "bo": s * jax.random.normal(keys[7], (1, d_model), jnp.float32),
            "w1": s * jax.random.normal(keys[8], (d_model, mlp_hidden), jnp.float32),
            "b1": s * jax.random.normal(keys[9], (1, mlp_hidden), jnp.float32),
            "w2": s * jax.random.normal(keys[10], (mlp_hidden, d_model), jnp.float32),
            "b2": s * jax.random.normal(keys[11], (1, d_model), jnp.float32),
        })
    return layers


# ----------------------------- main -------------------------------------------

if __name__ == "__main__":
    B, S = 2, 8                 # batch, sequence
    NUM_HEADS, KEY_SIZE = 4, 8  # model_config.num_heads / key_size
    D = NUM_HEADS * KEY_SIZE    # d_model = 32
    MLP_HIDDEN = 64
    NUM_LAYERS = 2              # model_config.num_layers

    key = jax.random.PRNGKey(0)
    kx, kp = jax.random.split(key)
    x = jax.random.normal(kx, (B, S, D), jnp.float32)
    params = init_params(kp, num_layers=NUM_LAYERS, d_model=D,
                         num_heads=NUM_HEADS, key_size=KEY_SIZE,
                         mlp_hidden=MLP_HIDDEN)

    out = transformer_forward_pallas(x, params,
                                     num_heads=NUM_HEADS, key_size=KEY_SIZE)
    out = jax.block_until_ready(out)
    assert out.shape == (B, S, D)

    ref_mixed = reference_mixed(x, params, num_heads=NUM_HEADS, key_size=KEY_SIZE)
    ref_full = reference_f32(x, params, num_heads=NUM_HEADS, key_size=KEY_SIZE)

    # Check against a reference that mirrors the kernel's bf16/f32 numerics
    # (slightly loosened for the approximate-EUP softmax reciprocal).
    assert jnp.allclose(out, ref_mixed, rtol=1e-2, atol=1e-2), \
        "mismatch vs. bf16-mirrored JAX reference"
    # Loose check against the pure-f32 semantics of the original module.
    assert jnp.allclose(out, ref_full, rtol=5e-2, atol=5e-2), \
        "mismatch vs. f32 JAX reference"

    print("KERNEL_OK")
</pallas_src>

<mosaic_0001>
module attributes {stable_mosaic.version = 11 : i64} {
  func.func @fused_transformer_layers_kernel(%arg0: i32, %arg1: i32, %arg2: memref<8x128xf32, #tpu.memory_space<vmem>>, %arg3: memref<1x128x32xbf16, #tpu.memory_space<vmem>>, %arg4: memref<1x1x32xf32, #tpu.memory_space<vmem>>, %arg5: memref<1x128x32xbf16, #tpu.memory_space<vmem>>, %arg6: memref<1x1x32xf32, #tpu.memory_space<vmem>>, %arg7: memref<1x128x32xbf16, #tpu.memory_space<vmem>>, %arg8: memref<1x1x32xf32, #tpu.memory_space<vmem>>, %arg9: memref<1x32x128xbf16, #tpu.memory_space<vmem>>, %arg10: memref<1x1x128xf32, #tpu.memory_space<vmem>>, %arg11: memref<1x128x128xbf16, #tpu.memory_space<vmem>>, %arg12: memref<1x1x128xf32, #tpu.memory_space<vmem>>, %arg13: memref<1x128x128xbf16, #tpu.memory_space<vmem>>, %arg14: memref<1x1x128xf32, #tpu.memory_space<vmem>>, %arg15: memref<8x128xf32, #tpu.memory_space<vmem>>) attributes {dimension_semantics = [#tpu.dimension_semantics<parallel>, #tpu.dimension_semantics<arbitrary>], iteration_bounds = array<i64: 2, 2>, scalar_prefetch = 0 : i64, scratch_operands = 0 : i64, tpu.core_type = #tpu.core_type<tc>, window_params = [{transform_indices = @transform_0, window_bounds = array<i64: 8, 128>}, {transform_indices = @transform_1, window_bounds = array<i64: 1, 128, 32>}, {transform_indices = @transform_2, window_bounds = array<i64: 1, 1, 32>}, {transform_indices = @transform_3, window_bounds = array<i64: 1, 128, 32>}, {transform_indices = @transform_4, window_bounds = array<i64: 1, 1, 32>}, {transform_indices = @transform_5, window_bounds = array<i64: 1, 128, 32>}, {transform_indices = @transform_6, window_bounds = array<i64: 1, 1, 32>}, {transform_indices = @transform_7, window_bounds = array<i64: 1, 32, 128>}, {transform_indices = @transform_8, window_bounds = array<i64: 1, 1, 128>}, {transform_indices = @transform_9, window_bounds = array<i64: 1, 128, 128>}, {transform_indices = @transform_10, window_bounds = array<i64: 1, 1, 128>}, {transform_indices = @transform_11, window_bounds = array<i64: 1, 128, 128>}, {transform_indices = @transform_12, window_bounds = array<i64: 1, 1, 128>}, {transform_indices = @transform_13, window_bounds = array<i64: 8, 128>}]} {
    %c0_i32 = arith.constant 0 : i32
    %0 = arith.cmpi eq, %arg1, %c0_i32 : i32
    %1 = arith.extui %0 : i1 to i32
    %c0_i32_0 = arith.constant 0 : i32
    %2 = arith.cmpi ne, %1, %c0_i32_0 : i32
    scf.if %2 {
      %c0_51 = arith.constant 0 : index
      %c0_52 = arith.constant 0 : index
      %81 = vector.load %arg2[%c0_51, %c0_52] : memref<8x128xf32, #tpu.memory_space<vmem>>, vector<8x128xf32>
      %c0_53 = arith.constant 0 : index
      %c0_54 = arith.constant 0 : index
      %82 = vector.load %arg15[%c0_53, %c0_54] : memref<8x128xf32, #tpu.memory_space<vmem>>, vector<8x128xf32>
      tpu.vector_store %arg15[%c0_53, %c0_54], %81 {strides = array<i32>} : memref<8x128xf32, #tpu.memory_space<vmem>>, vector<8x128xf32>,
    } else {
    }
    %c0 = arith.constant 0 : index
    %c0_1 = arith.constant 0 : index
    %3 = vector.load %arg15[%c0, %c0_1] : memref<8x128xf32, #tpu.memory_space<vmem>>, vector<8x128xf32>
    %4 = arith.truncf %3 : vector<8x128xf32> to vector<8x128xbf16>
    %c0_2 = arith.constant 0 : index
    %c0_3 = arith.constant 0 : index
    %c0_4 = arith.constant 0 : index
    %5 = vector.load %arg3[%c0_2, %c0_3, %c0_4] : memref<1x128x32xbf16, #tpu.memory_space<vmem>>, vector<1x128x32xbf16>
    %6 = vector.shape_cast %5 : vector<1x128x32xbf16> to vector<128x32xbf16>
    %cst = arith.constant dense<0.000000e+00> : vector<8x32xf32>
    %7 = tpu.matmul %4, %6, %cst {dimension_numbers = #tpu.dot_dimension_numbers<[1], [0], [0], [1], [0, 0, 1, 1], [], []>} : vector<8x128xbf16>, vector<128x32xbf16>, vector<8x32xf32> -> vector<8x32xf32>
    %c0_5 = arith.constant 0 : index
    %c0_6 = arith.constant 0 : index
    %c0_7 = arith.constant 0 : index
    %8 = vector.load %arg4[%c0_5, %c0_6, %c0_7] : memref<1x1x32xf32, #tpu.memory_space<vmem>>, vector<1x1x32xf32>
    %9 = vector.shape_cast %8 : vector<1x1x32xf32> to vector<1x32xf32>
    %10 = vector.broadcast %9 : vector<1x32xf32> to vector<8x32xf32>
    %11 = arith.addf %7, %10 : vector<8x32xf32>
    %c0_8 = arith.constant 0 : index
    %c0_9 = arith.constant 0 : index
    %c0_10 = arith.constant 0 : index
    %12 = vector.load %arg5[%c0_8, %c0_9, %c0_10] : memref<1x128x32xbf16, #tpu.memory_space<vmem>>, vector<1x128x32xbf16>
    %13 = vector.shape_cast %12 : vector<1x128x32xbf16> to vector<128x32xbf16>
    %cst_11 = arith.constant dense<0.000000e+00> : vector<8x32xf32>
    %14 = tpu.matmul %4, %13, %cst_11 {dimension_numbers = #tpu.dot_dimension_numbers<[1], [0], [0], [1], [0, 0, 1, 1], [], []>} : vector<8x128xbf16>, vector<128x32xbf16>, vector<8x32xf32> -> vector<8x32xf32>
    %c0_12 = arith.constant 0 : index
    %c0_13 = arith.constant 0 : index
    %c0_14 = arith.constant 0 : index
    %15 = vector.load %arg6[%c0_12, %c0_13, %c0_14] : memref<1x1x32xf32, #tpu.memory_space<vmem>>, vector<1x1x32xf32>
    %16 = vector.shape_cast %15 : vector<1x1x32xf32> to vector<1x32xf32>
    %17 = vector.broadcast %16 : vector<1x32xf32> to vector<8x32xf32>
    %18 = arith.addf %14, %17 : vector<8x32xf32>
    %c0_15 = arith.constant 0 : index
    %c0_16 = arith.constant 0 : index
    %c0_17 = arith.constant 0 : index
    %19 = vector.load %arg7[%c0_15, %c0_16, %c0_17] : memref<1x128x32xbf16, #tpu.memory_space<vmem>>, vector<1x128x32xbf16>
    %20 = vector.shape_cast %19 : vector<1x128x32xbf16> to vector<128x32xbf16>
    %cst_18 = arith.constant dense<0.000000e+00> : vector<8x32xf32>
    %21 = tpu.matmul %4, %20, %cst_18 {dimension_numbers = #tpu.dot_dimension_numbers<[1], [0], [0], [1], [0, 0, 1, 1], [], []>} : vector<8x128xbf16>, vector<128x32xbf16>, vector<8x32xf32> -> vector<8x32xf32>
    %c0_19 = arith.constant 0 : index
    %c0_20 = arith.constant 0 : index
    %c0_21 = arith.constant 0 : index
    %22 = vector.load %arg8[%c0_19, %c0_20, %c0_21] : memref<1x1x32xf32, #tpu.memory_space<vmem>>, vector<1x1x32xf32>
    %23 = vector.shape_cast %22 : vector<1x1x32xf32> to vector<1x32xf32>
    %24 = vector.broadcast %23 : vector<1x32xf32> to vector<8x32xf32>
    %25 = arith.addf %21, %24 : vector<8x32xf32>
    %26 = vector.shape_cast %11 : vector<8x32xf32> to vector<8x4x8xf32>
    %27 = tpu.transpose %26, [1, 0, 2] : vector<8x4x8xf32> -> vector<4x8x8xf32>
    %28 = vector.shape_cast %18 : vector<8x32xf32> to vector<8x4x8xf32>
    %29 = tpu.transpose %28, [1, 0, 2] : vector<8x4x8xf32> -> vector<4x8x8xf32>
    %30 = vector.shape_cast %25 : vector<8x32xf32> to vector<8x4x8xf32>
    %31 = tpu.transpose %30, [1, 0, 2] : vector<8x4x8xf32> -> vector<4x8x8xf32>
    %32 = arith.truncf %27 : vector<4x8x8xf32> to vector<4x8x8xbf16>
    %33 = arith.truncf %29 : vector<4x8x8xf32> to vector<4x8x8xbf16>
    "tpu.trace_start"() <{level = 10 : i32, message = "hqk,htk->hqt"}> : () -> ()
    %cst_22 = arith.constant dense<0.000000e+00> : vector<4x8x8xf32>
    %34 = tpu.matmul %32, %33, %cst_22 {dimension_numbers = #tpu.dot_dimension_numbers<[2], [2], [1], [1], [0, 0, 0, 1, 1, 1], [0], [0]>} : vector<4x8x8xbf16>, vector<4x8x8xbf16>, vector<4x8x8xf32> -> vector<4x8x8xf32>
    "tpu.trace_stop"() : () -> ()
    %cst_23 = arith.constant 0.353553385 : f32
    %35 = vector.broadcast %cst_23 : f32 to vector<4x8x8xf32>
    %36 = arith.mulf %34, %35 : vector<4x8x8xf32>
    %cst_24 = arith.constant dense<0xFF800000> : vector<4x8xf32>
    %37 = vector.multi_reduction <maximumf>, %36, %cst_24 [2] : vector<4x8x8xf32> to vector<4x8xf32>
    %38 = vector.shape_cast %37 : vector<4x8xf32> to vector<4x8x1xf32>
    %39 = vector.broadcast %38 : vector<4x8x1xf32> to vector<4x8x8xf32>
    %40 = arith.subf %36, %39 : vector<4x8x8xf32>
    %41 = math.exp %40 : vector<4x8x8xf32>
    %cst_25 = arith.constant dense<0.000000e+00> : vector<4x8xf32>
    %42 = vector.multi_reduction <add>, %41, %cst_25 [2] : vector<4x8x8xf32> to vector<4x8xf32>
    %43 = vector.shape_cast %42 : vector<4x8xf32> to vector<4x8x1xf32>
    %44 = tpu.reciprocal %43 {approx = true} : vector<4x8x1xf32> -> vector<4x8x1xf32>
    %45 = vector.broadcast %44 : vector<4x8x1xf32> to vector<4x8x8xf32>
    %46 = arith.mulf %41, %45 : vector<4x8x8xf32>
    %47 = arith.truncf %46 : vector<4x8x8xf32> to vector<4x8x8xbf16>
    %48 = arith.truncf %31 : vector<4x8x8xf32> to vector<4x8x8xbf16>
    "tpu.trace_start"() <{level = 10 : i32, message = "hqt,htk->hqk"}> : () -> ()
    %cst_26 = arith.constant dense<0.000000e+00> : vector<4x8x8xf32>
    %49 = tpu.matmul %47, %48, %cst_26 {dimension_numbers = #tpu.dot_dimension_numbers<[2], [1], [1], [2], [0, 0, 0, 1, 1, 2], [0], [0]>} : vector<4x8x8xbf16>, vector<4x8x8xbf16>, vector<4x8x8xf32> -> vector<4x8x8xf32>
    "tpu.trace_stop"() : () -> ()
    %50 = tpu.transpose %49, [1, 0, 2] : vector<4x8x8xf32> -> vector<8x4x8xf32>
    %51 = vector.shape_cast %50 : vector<8x4x8xf32> to vector<8x32xf32>
    %52 = arith.truncf %51 : vector<8x32xf32> to vector<8x32xbf16>
    %c0_27 = arith.constant 0 : index
    %c0_28 = arith.constant 0 : index
    %c0_29 = arith.constant 0 : index
    %53 = vector.load %arg9[%c0_27, %c0_28, %c0_29] : memref<1x32x128xbf16, #tpu.memory_space<vmem>>, vector<1x32x128xbf16>
    %54 = vector.shape_cast %53 : vector<1x32x128xbf16> to vector<32x128xbf16>
    %cst_30 = arith.constant dense<0.000000e+00> : vector<8x128xf32>
    %55 = tpu.matmul %52, %54, %cst_30 {dimension_numbers = #tpu.dot_dimension_numbers<[1], [0], [0], [1], [0, 0, 1, 1], [], []>} : vector<8x32xbf16>, vector<32x128xbf16>, vector<8x128xf32> -> vector<8x128xf32>
    %c0_31 = arith.constant 0 : index
    %c0_32 = arith.constant 0 : index
    %c0_33 = arith.constant 0 : index
    %56 = vector.load %arg10[%c0_31, %c0_32, %c0_33] : memref<1x1x128xf32, #tpu.memory_space<vmem>>, vector<1x1x128xf32>
    %57 = vector.shape_cast %56 : vector<1x1x128xf32> to vector<1x128xf32>
    %58 = vector.broadcast %57 : vector<1x128xf32> to vector<8x128xf32>
    %59 = arith.addf %55, %58 : vector<8x128xf32>
    %60 = arith.addf %3, %59 : vector<8x128xf32>
    %61 = arith.truncf %60 : vector<8x128xf32> to vector<8x128xbf16>
    %c0_34 = arith.constant 0 : index
    %c0_35 = arith.constant 0 : index
    %c0_36 = arith.constant 0 : index
    %62 = vector.load %arg11[%c0_34, %c0_35, %c0_36] : memref<1x128x128xbf16, #tpu.memory_space<vmem>>, vector<1x128x128xbf16>
    %63 = vector.shape_cast %62 : vector<1x128x128xbf16> to vector<128x128xbf16>
    %cst_37 = arith.constant dense<0.000000e+00> : vector<8x128xf32>
    %64 = tpu.matmul %61, %63, %cst_37 {dimension_numbers = #tpu.dot_dimension_numbers<[1], [0], [0], [1], [0, 0, 1, 1], [], []>} : vector<8x128xbf16>, vector<128x128xbf16>, vector<8x128xf32> -> vector<8x128xf32>
    %c0_38 = arith.constant 0 : index
    %c0_39 = arith.constant 0 : index
    %c0_40 = arith.constant 0 : index
    %65 = vector.load %arg12[%c0_38, %c0_39, %c0_40] : memref<1x1x128xf32, #tpu.memory_space<vmem>>, vector<1x1x128xf32>
    %66 = vector.shape_cast %65 : vector<1x1x128xf32> to vector<1x128xf32>
    %67 = vector.broadcast %66 : vector<1x128xf32> to vector<8x128xf32>
    %68 = arith.addf %64, %67 : vector<8x128xf32>
    %cst_41 = arith.constant 0.000000e+00 : f32
    %69 = vector.broadcast %cst_41 : f32 to vector<8x128xf32>
    %70 = arith.maximumf %68, %69 : vector<8x128xf32>
    %71 = arith.truncf %70 : vector<8x128xf32> to vector<8x128xbf16>
    %c0_42 = arith.constant 0 : index
    %c0_43 = arith.constant 0 : index
    %c0_44 = arith.constant 0 : index
    %72 = vector.load %arg13[%c0_42, %c0_43, %c0_44] : memref<1x128x128xbf16, #tpu.memory_space<vmem>>, vector<1x128x128xbf16>
    %73 = vector.shape_cast %72 : vector<1x128x128xbf16> to vector<128x128xbf16>
    %cst_45 = arith.constant dense<0.000000e+00> : vector<8x128xf32>
    %74 = tpu.matmul %71, %73, %cst_45 {dimension_numbers = #tpu.dot_dimension_numbers<[1], [0], [0], [1], [0, 0, 1, 1], [], []>} : vector<8x128xbf16>, vector<128x128xbf16>, vector<8x128xf32> -> vector<8x128xf32>
    %c0_46 = arith.constant 0 : index
    %c0_47 = arith.constant 0 : index
    %c0_48 = arith.constant 0 : index
    %75 = vector.load %arg14[%c0_46, %c0_47, %c0_48] : memref<1x1x128xf32, #tpu.memory_space<vmem>>, vector<1x1x128xf32>
    %76 = vector.shape_cast %75 : vector<1x1x128xf32> to vector<1x128xf32>
    %77 = vector.broadcast %76 : vector<1x128xf32> to vector<8x128xf32>
    %78 = arith.addf %74, %77 : vector<8x128xf32>
    %79 = arith.addf %60, %78 : vector<8x128xf32>
    %c0_49 = arith.constant 0 : index
    %c0_50 = arith.constant 0 : index
    %80 = vector.load %arg15[%c0_49, %c0_50] : memref<8x128xf32, #tpu.memory_space<vmem>>, vector<8x128xf32>
    tpu.vector_store %arg15[%c0_49, %c0_50], %79 {strides = array<i32>} : memref<8x128xf32, #tpu.memory_space<vmem>>, vector<8x128xf32>,
    return
  }
  func.func @transform_0(%arg0: i32, %arg1: i32) -> (i32, i32) {
    %c0_i32 = arith.constant 0 : i32
    %c0_i32_0 = arith.constant 0 : i32
    return %arg0, %c0_i32 : i32, i32
  }
  func.func @transform_1(%arg0: i32, %arg1: i32) -> (i32, i32, i32) {
    %c0_i32 = arith.constant 0 : i32
    %c0_i32_0 = arith.constant 0 : i32
    %c0_i32_1 = arith.constant 0 : i32
    return %arg1, %c0_i32, %c0_i32_0 : i32, i32, i32
  }
  func.func @transform_2(%arg0: i32, %arg1: i32) -> (i32, i32, i32) {
    %c0_i32 = arith.constant 0 : i32
    %c0_i32_0 = arith.constant 0 : i32
    %c0_i32_1 = arith.constant 0 : i32
    return %arg1, %c0_i32, %c0_i32_0 : i32, i32, i32
  }
  func.func @transform_3(%arg0: i32, %arg1: i32) -> (i32, i32, i32) {
    %c0_i32 = arith.constant 0 : i32
    %c0_i32_0 = arith.constant 0 : i32
    %c0_i32_1 = arith.constant 0 : i32
    return %arg1, %c0_i32, %c0_i32_0 : i32, i32, i32
  }
  func.func @transform_4(%arg0: i32, %arg1: i32) -> (i32, i32, i32) {
    %c0_i32 = arith.constant 0 : i32
    %c0_i32_0 = arith.constant 0 : i32
    %c0_i32_1 = arith.constant 0 : i32
    return %arg1, %c0_i32, %c0_i32_0 : i32, i32, i32
  }
  func.func @transform_5(%arg0: i32, %arg1: i32) -> (i32, i32, i32) {
    %c0_i32 = arith.constant 0 : i32
    %c0_i32_0 = arith.constant 0 : i32
    %c0_i32_1 = arith.constant 0 : i32
    return %arg1, %c0_i32, %c0_i32_0 : i32, i32, i32
  }
  func.func @transform_6(%arg0: i32, %arg1: i32) -> (i32, i32, i32) {
    %c0_i32 = arith.constant 0 : i32
    %c0_i32_0 = arith.constant 0 : i32
    %c0_i32_1 = arith.constant 0 : i32
    return %arg1, %c0_i32, %c0_i32_0 : i32, i32, i32
  }
  func.func @transform_7(%arg0: i32, %arg1: i32) -> (i32, i32, i32) {
    %c0_i32 = arith.constant 0 : i32
    %c0_i32_0 = arith.constant 0 : i32
    %c0_i32_1 = arith.constant 0 : i32
    return %arg1, %c0_i32, %c0_i32_0 : i32, i32, i32
  }
  func.func @transform_8(%arg0: i32, %arg1: i32) -> (i32, i32, i32) {
    %c0_i32 = arith.constant 0 : i32
    %c0_i32_0 = arith.constant 0 : i32
    %c0_i32_1 = arith.constant 0 : i32
    return %arg1, %c0_i32, %c0_i32_0 : i32, i32, i32
  }
  func.func @transform_9(%arg0: i32, %arg1: i32) -> (i32, i32, i32) {
    %c0_i32 = arith.constant 0 : i32
    %c0_i32_0 = arith.constant 0 : i32
    %c0_i32_1 = arith.constant 0 : i32
    return %arg1, %c0_i32, %c0_i32_0 : i32, i32, i32
  }
  func.func @transform_10(%arg0: i32, %arg1: i32) -> (i32, i32, i32) {
    %c0_i32 = arith.constant 0 : i32
    %c0_i32_0 = arith.constant 0 : i32
    %c0_i32_1 = arith.constant 0 : i32
    return %arg1, %c0_i32, %c0_i32_0 : i32, i32, i32
  }
  func.func @transform_11(%arg0: i32, %arg1: i32) -> (i32, i32, i32) {
    %c0_i32 = arith.constant 0 : i32
    %c0_i32_0 = arith.constant 0 : i32
    %c0_i32_1 = arith.constant 0 : i32
    return %arg1, %c0_i32, %c0_i32_0 : i32, i32, i32
  }
  func.func @transform_12(%arg0: i32, %arg1: i32) -> (i32, i32, i32) {
    %c0_i32 = arith.constant 0 : i32
    %c0_i32_0 = arith.constant 0 : i32
    %c0_i32_1 = arith.constant 0 : i32
    return %arg1, %c0_i32, %c0_i32_0 : i32, i32, i32
  }
  func.func @transform_13(%arg0: i32, %arg1: i32) -> (i32, i32) {
    %c0_i32 = arith.constant 0 : i32
    %c0_i32_0 = arith.constant 0 : i32
    return %arg0, %c0_i32 : i32, i32
  }
}

</mosaic_0001>

<bundles_post_ra>
// kernel: tpu_custom_call.1
= control target key start
LH: loop header
LB: loop body
LE: loop exit
PB: predicated region body
PF: predicated region fallthrough
CT: control target
= control target key end

     0   :  { %s3643_s0 = inlined_call_operand.vmem [shape: f32[16,128], index: 0, kind: input, shape index: {}]   ;;  %s3644_s1 = inlined_call_operand.vmem [shape: bf16[2,128,32], index: 1, kind: input, shape index: {}]   ;;  %s3645_s2 = inlined_call_operand.vmem [shape: f32[2,1,32], index: 2, kind: input, shape index: {}]   ;;  %s3646_s3 = inlined_call_operand.vmem [shape: bf16[2,128,32], index: 3, kind: input, shape index: {}]   ;;  %s3647_s4 = inlined_call_operand.vmem [shape: f32[2,1,32], index: 4, kind: input, shape index: {}]   ;;  %s3648_s5 = inlined_call_operand.vmem [shape: bf16[2,128,32], index: 5, kind: input, shape index: {}]   ;;  %s3649_s6 = inlined_call_operand.vmem [shape: f32[2,1,32], index: 6, kind: input, shape index: {}]   ;;  %s3650_s7 = inlined_call_operand.vmem [shape: bf16[2,32,128], index: 7, kind: input, shape index: {}]   ;;  %s3651_s8 = inlined_call_operand.vmem [shape: f32[2,1,128], index: 8, kind: input, shape index: {}]   ;;  %s3652_s9 = inlined_call_operand.vmem [shape: bf16[2,128,128], index: 9, kind: input, shape index: {}]   ;;  %s3653_s10 = inlined_call_operand.vmem [shape: f32[2,1,128], index: 10, kind: input, shape index: {}]   ;;  %s3654_s11 = inlined_call_operand.vmem [shape: bf16[2,128,128], index: 11, kind: input, shape index: {}]   ;;  %s3655_s12 = inlined_call_operand.vmem [shape: f32[2,1,128], index: 12, kind: input, shape index: {}]   ;;  %s3656_s13 = inlined_call_operand.hbm [shape: f32[16,128], index: 13, kind: output, shape index: {}]  }
   0x1   :  { %3672 = sst [smem:[#allocation18_spill]] %s3643_s0 }
   0x2   :  { %3673 = sst [smem:[#allocation19_spill]] %s3644_s1 }
   0x3   :  { %3674 = sst [smem:[#allocation20_spill]] %s3645_s2 }
   0x4   :  { %3675 = sst [smem:[#allocation21_spill]] %s3646_s3 }
   0x5   :  { %3676 = sst [smem:[#allocation22_spill]] %s3648_s5 }
   0x6   :  { %3677 = sst [smem:[#allocation23_spill]] %s3656_s13 }
   0x7   :  { %18 = vsyncpa [#allocation3], 0 }
   0x8   :  { %20 = vsyncpa [#allocation3 + $0x1], 0  ;;  %s3154_s25 = smov 0   ;;  %s3156_s26 = smov 0  }
   0x9   :  { %s3158_s27 = smov 0   ;;  %s3160_s28 = smov 0  }
   0xa   :  { %s3162_s29 = smov 0   ;;  %s3164_s30 = smov 0  }
   0xb   :  { %s3166_s14 = smov 0   ;;  %s3168_s15 = smov 0  }
   0xc LB: > { %3678 = sst [smem:[#allocation5_spill]] %s3043_s25  ;;  %s2525_s16 = sadd.s32 4294967295, %s3071_s15   ;;  %s3071_s15 = sphi %s3168_s15, %s26_s15   ;;  %s3067_s14 = sphi %s3166_s14, %s3717_s14   ;;  %s3063_s30 = sphi %s3164_s30, %s3716_s30   ;;  %s3059_s29 = sphi %s3162_s29, %s3715_s29   ;;  %s3055_s28 = sphi %s3160_s28, %s3714_s28   ;;  %s3051_s27 = sphi %s3158_s27, %s3713_s27   ;;  %s3047_s26 = sphi %s3156_s26, %s3712_s26   ;;  %s3043_s25 = sphi %s3154_s25, %s3711_s25  }
   0xd   : > { %3679 = sst [smem:[#allocation6_spill]] %s3047_s26  ;;  %s2526_s17 = sadd.s32 4294967294, %s3071_s15  }
   0xe   : > { %3680 = sst [smem:[#allocation7_spill]] %s3051_s27  ;;  %s35_s18 = sadd.s32 1, %s3063_s30 }
   0xf   : > { %3681 = sst [smem:[#allocation8_spill]] %s3055_s28  ;;  %p36_p0 = scmp.ge.s32.totalorder %s35_s18, 2 }
  0x10   : > { %3682 = sst [smem:[#allocation9_spill]] %s3059_s29  ;;  %s38_s19 = sadd.s32 1, %s3067_s14 }
  0x11   : > { %3683 = sst [smem:[#allocation10_spill]] %s3063_s30  ;;  %p393_p1 = scmp.ne.s32.totalorder %s3051_s27, %s3047_s26 }
  0x12   : > { %3684 = sst [smem:[#allocation11_spill]] %s3067_s14  ;;  %p394_p2 = scmp.eq.s32.totalorder %s2525_s16, 3 }
  0x13   : > { %3685 = sst [smem:[#allocation12_spill]] %s3071_s15  ;;  %s3719_s18 = smov (%p36_p0, %s35_s18), 0 }
  0x14   : > { %3686 = sst [smem:[#allocation13_spill]] %s3719_s18  ;;  %s3721_s19 = smov (!%p36_p0, %s38_s19), %s3067_s14 }
  0x15   : > { %p3203_p3 = por %p394_p2, %p393_p1  ;;  %p399_p4 = scmp.ne.s32.totalorder %s3047_s26, %s3043_s25 }
  0x16   : > { %p40_p5 = scmp.ge.s32.totalorder %s3721_s19, 2  ;;  %p400_p6 = scmp.eq.s32.totalorder %s2526_s17, 3 }
  0x17   : > { %s3687_s20 = scalar_select %p3203_p3, 1, 0 }
  0x18   : > { %p2529_p7 = scmp.ge.s32.totalorder %s3071_s15, 1  ;;  %p509_p8 = scmp.lt.s32.totalorder %s3071_s15, 5 }
  0x19   : > { %3688 = sst [smem:[#allocation14_spill]] %s3687_s20  ;;  %s3723_s19 = smov (%p40_p5, %s3721_s19), 0 }
  0x1a   : > { %3689 = sst [smem:[#allocation15_spill]] %s3723_s19  ;;  %p3213_p9 = por %p400_p6, %p399_p4 }
  0x1b   : > { %p510_p10 = pnand %p2529_p7, %p509_p8  ;;  %s380_s22 = ssub.s32 %s3067_s14, %s3723_s19 }
  0x1c   : > { %s3690_s21 = scalar_select %p3213_p9, 1, 0 }
  0x1d   : > { %s383_s23 = sadd.s32 1, %s3051_s27  ;;  %p381_p11 = scmp.eq.s32.totalorder %s380_s22, 0 }
  0x1e   : > { %3691 = sst [smem:[#allocation16_spill]] %s3690_s21  ;;  %513 = sbr.rel (%p510_p10) target bundleno = 1945 (0x799), region = 72 }
  0x1f   : > { %s3221_s24 = scalar_select %p381_p11, %s3051_s27, %s383_s23  }
  0x20   : > { %s3661_s16 = sand.u32 (!%p510_p10), 1, %s3047_s26   ;;  %p600_p12 = scmp.lt.s32.totalorder (!%p510_p10), %s3059_s29, 1 }
  0x21   : > { %3692 = sst [smem:[#allocation17_spill]] %s3221_s24  ;;  %s2530_s17 = sshll.u32 (!%p510_p10), %s3661_s16, 3 }
  0x22   : > { %p604_p13 = scmp.lt.s32.totalorder (!%p510_p10), %s3055_s28, 1  ;;  %s3693_s0 = sld [smem:[#allocation18_spill]] (!%p510_p10) }
  0x23   : > { %s601_s18 = scalar_select %p600_p12, %s3059_s29, 1 }
  0x24   : > { %s3230_s30 = scalar_select %p604_p13, %s3055_s28, 1 }
  0x25   : > { %s2531_s22 = sshll.u32 %s601_s18, 3  ;;  %s3694_s1 = sld [smem:[#allocation19_spill]] }
  0x26   : > { %s2614_s24 = sshll.u32 %s3230_s30, 6  ;;  %s3696_s3 = sld [smem:[#allocation21_spill]] }
  0x27   : > { %s3697_s5 = sld [smem:[#allocation22_spill]]  ;;  %s2617_s25 = sshll.u32 %s3230_s30, 4 }
  0x28   : > { %s603_s14 = scalar_lea.vmem %s3693_s0, %s2531_s22  ;;  %s635_s26 = scalar_lea.vmem %s3651_s8, %s3230_s30 }
  0x29   : > { %s3271_s2 = scalar_lea.vmem %s3650_s7, %s2617_s25  ;;  %s3276_s22 = scalar_lea.vmem %s3652_s9, %s2614_s24 }
  0x2a   : > { %s643_s27 = scalar_lea.vmem %s3653_s10, %s3230_s30  ;;  %s3291_s25 = scalar_lea.vmem [#allocation2], %s2530_s17 }
  0x2b   : > { %s3239_s21 = scalar_lea.vmem %s3694_s1, %s2614_s24  ;;  %s3698_s20 = sld [smem:[#allocation8_spill]] }
  0x2c   : > { %s3248_s29 = scalar_lea.vmem %s3696_s3, %s2614_s24  ;;  %s651_s3 = scalar_lea.vmem %s3655_s12, %s3230_s30 }
  0x2d   : > { %s3257_s0 = scalar_lea.vmem %s3697_s5, %s2614_s24  ;;  %s3285_s5 = scalar_lea.vmem %s3654_s11, %s2614_s24 }
  0x31   : > { %p2544_p0 = scmp.ne.s32.totalorder %s3698_s20, 0 }
  0x33   : > { %656 = sbr.rel (%p2544_p0) target bundleno = 58 (0x3a), region = 76 }
  0x38   : > { %v657_v0 = vld [vmem:[%s603_s14] sm:$0xff] }
  0x39   : > { %658 = vst [vmem:[%s3291_s25] sm:$0xff] %v657_v0 }
  0x3a PF: > { %v2921_v1 = vld [vmem:[%s3248_s29 + $0x38] sm:$0xff]   ;;  %v3073_v2 = vmov 0.0   ;;  %v2923_v4 = vld [vmem:[%s3248_s29 + $0x30] sm:$0xff]   ;;  %vm3074_vm0 = vmmov 0   ;;  %v2925_v6 = vld [vmem:[%s3248_s29 + $0x28] sm:$0xff]   ;;  %s3699_s14 = scalar_lea.vmem %s3647_s4, %s3230_s30  ;;  %s3700_s17 = sld [smem:[#allocation20_spill]]  ;;  %v1009_v42 = vlaneseq }
  0x3b   : > { %2704 = vmatprep.subr.bf16.mxu1 %v3073_v2  ;;  %2684 = vmatprep.subr.bf16.mxu0 %v3073_v2  ;;  %v2922_v3 = vld [vmem:[%s3239_s21 + $0x38] sm:$0xff]   ;;  %v2924_v5 = vld [vmem:[%s3239_s21 + $0x30] sm:$0xff]   ;;  %v2926_v7 = vld [vmem:[%s3239_s21 + $0x28] sm:$0xff]   ;;  %s3075_s28 = smov 104   ;;  %s3076_s18 = smov 120   ;;  %vm1440_vm1 = vcmask 64512  }
  0x3c   : > { %2705 = vmatpush3.bf16.msra.mxu1 %v2921_v1  ;;  %2720 = vmatprep.mubr.msk.bf16.mxu1 %vm3074_vm0, %v3073_v2  ;;  %v2927_v8 = vld [vmem:[%s3248_s29 + $0x20] sm:$0xff]   ;;  %v2929_v10 = vld [vmem:[%s3248_s29 + $0x18] sm:$0xff]   ;;  %v2931_v12 = vld [vmem:[%s3248_s29 + $0x10] sm:$0xff]   ;;  %s3077_s23 = smov 112   ;;  %v3078_v40 = vmov 1983009808   ;;  %s3702_s13 = scalar_lea.vmem %s3649_s6, %s3230_s30 }
  0x3d   : > { %2685 = vmatpush3.bf16.msra.mxu0 %v2922_v3  ;;  %2706 = vmatprep.subr.bf16.mxu1 %v3073_v2  ;;  %v2928_v9 = vld [vmem:[%s3239_s21 + $0x20] sm:$0xff]   ;;  %v2930_v11 = vld [vmem:[%s3239_s21 + $0x18] sm:$0xff]   ;;  %v2932_v13 = vld [vmem:[%s3239_s21 + $0x10] sm:$0xff]   ;;  %v1007_v41 = vunpack.c.l.s4 %v3078_v40  ;;  %v3079_v43 = vmov 1934713408   ;;  %v1010_v46 = vshrl.u32 %v1009_v42, 7 }
  0x3e   : > { %2686 = vmatprep.subr.bf16.mxu0 %v3073_v2  ;;  %2700 = vmatprep.mubr.msk.bf16.mxu0 %vm3074_vm0, %v3073_v2  ;;  %v2933_v14 = vld [vmem:[%s3248_s29 + $0x8] sm:$0xff]   ;;  %v2935_v16 = vld [vmem:[%s3248_s29] sm:$0xff]   ;;  %v2937_v32 = vld [vmem:[%s3257_s0 + $0x38] sm:$0xff]   ;;  %v1039_v44 = vunpack.c.l.s4 %v3079_v43  ;;  %vm1684_vm2 = vcmask 1043456   ;;  %s3081_s15 = smov 8   ;;  %s3082_s20 = smov 24  }
  0x3f   : > { %v2934_v15 = vld [vmem:[%s3239_s21 + $0x8] sm:$0xff]   ;;  %v2936_v18 = vld [vmem:[%s3239_s21] sm:$0xff]   ;;  %v2938_v33 = vld [vmem:[%s3257_s0 + $0x30] sm:$0xff]   ;;  %v1008_v45 = vunpack.c.0.s8 %v1007_v41  ;;  %vm2015_vm3 = vcmask 130048   ;;  %vm2017_vm4 = vcmask 195584   ;;  %vm2043_vm5 = vcmask 261120  }
  0x40   : > { %2707 = vmatpush3.bf16.msra.mxu1 %v2923_v4  ;;  %v3329_v17 = vld [vmem:[%s3291_s25] sm:$0xff]  ;;  %s3701_s19 = scalar_lea.vmem %s3700_s17, %s3230_s30  ;;  %v2941_v36 = vld [vmem:[%s3257_s0 + $0x18] sm:$0xff]   ;;  %v2942_v37 = vld [vmem:[%s3257_s0 + $0x10] sm:$0xff]   ;;  %v1040_v49 = vunpack.c.0.s8 %v1039_v44  ;;  %s3703_s29 = sld [smem:[#allocation9_spill]] }
  0x41   : > { %2687 = vmatpush3.bf16.msra.mxu0 %v2924_v5  ;;  %2708 = vmatprep.subr.bf16.mxu1 %v3073_v2  ;;  %v660_v19 = vpack.c.bf16 %v3329_v17, %v3329_v17  ;;  %v2554_v20 = vld [vmem:[%s3699_s14] ss:$0 sm:$0xff]  ;;  %v2939_v34 = vld [vmem:[%s3257_s0 + $0x28] sm:$0xff]   ;;  %v3386_v50 = vsub.s32 %v1008_v45, %v1010_v46  ;;  %s3704_s21 = sld [smem:[#allocation6_spill]] }
  0x42   : > { %2688 = vmatprep.subr.bf16.mxu0 %v3073_v2  ;;  %v2545_v22 = vld [vmem:[%s3701_s19] ss:$0 sm:$0xff]  ;;  %v2943_v38 = vld [vmem:[%s3257_s0 + $0x8] sm:$0xff]   ;;  %v3390_v57 = vsub.s32 %v1040_v49, %v1010_v46 }
  0x43   : > { %v2940_v35 = vld [vmem:[%s3257_s0 + $0x20] sm:$0xff]  }
  0x44   : > { %2709 = vmatpush3.bf16.msra.mxu1 %v2925_v6  ;;  %v2944_v39 = vld [vmem:[%s3257_s0] sm:$0xff]  }
  0x45   : > { %2689 = vmatpush3.bf16.msra.mxu0 %v2926_v7  ;;  %2710 = vmatprep.subr.bf16.mxu1 %v3073_v2 }
  0x46   : > { %2690 = vmatprep.subr.bf16.mxu0 %v3073_v2  ;;  %s2611_s19 = sshll.u32 %s3703_s29, 7 }
  0x47   : > { %s3707_s30 = sand.u32 1, %s3704_s21  }
  0x48   : > { %2711 = vmatpush3.bf16.msra.mxu1 %v2927_v8 }
  0x49   : > { %2691 = vmatpush3.bf16.msra.mxu0 %v2928_v9  ;;  %2712 = vmatprep.subr.bf16.mxu1 %v3073_v2 }
  0x4a   : > { %2692 = vmatprep.subr.bf16.mxu0 %v3073_v2 }
  0x4c   : > { %2713 = vmatpush3.bf16.msra.mxu1 %v2929_v10 }
  0x4d   : > { %2693 = vmatpush3.bf16.msra.mxu0 %v2930_v11  ;;  %2714 = vmatprep.subr.bf16.mxu1 %v3073_v2 }
  0x4e   : > { %2694 = vmatprep.subr.bf16.mxu0 %v3073_v2 }
  0x50   : > { %2715 = vmatpush3.bf16.msra.mxu1 %v2931_v12 }
  0x51   : > { %2695 = vmatpush3.bf16.msra.mxu0 %v2932_v13  ;;  %2716 = vmatprep.subr.bf16.mxu1 %v3073_v2 }
  0x52   : > { %2696 = vmatprep.subr.bf16.mxu0 %v3073_v2 }
  0x54   : > { %2717 = vmatpush3.bf16.msra.mxu1 %v2933_v14 }
  0x55   : > { %2697 = vmatpush3.bf16.msra.mxu0 %v2934_v15  ;;  %2718 = vmatprep.subr.bf16.mxu1 %v3073_v2 }
  0x56   : > { %2698 = vmatprep.subr.bf16.mxu0 %v3073_v2 }
  0x58   : > { %2719 = vmatpush3.bf16.msra.mxu1 %v2935_v16 }
  0x59   : > { %2699 = vmatpush3.bf16.msra.mxu0 %v2936_v18  ;;  %2744 = vmatprep.subr.bf16.mxu1 %v3073_v2 }
  0x5a   : > { %2724 = vmatprep.subr.bf16.mxu0 %v3073_v2 }
  0x5b   : > { %2721 = vmatmul.mubr.bf16.vlgmr.msra.gmra.mxu1 %v660_v19 }
  0x5c   : > { %2701 = vmatmul.mubr.bf16.vlgmr.msra.gmra.mxu0 %v660_v19  ;;  %2746 = vmatprep.mubr.msk.bf16.mxu1 %vm3074_vm0, %v3073_v2 }
  0x5d   : > { %2740 = vmatprep.mubr.msk.bf16.mxu0 %vm3074_vm0, %v3073_v2  ;;  %2725 = vmatpush3.bf16.msra.mxu0 %v2937_v32 }
  0x5e   : > { %2726 = vmatprep.subr.bf16.mxu0 %v3073_v2 }
  0x61   : > { %2727 = vmatpush3.bf16.msra.mxu0 %v2938_v33 }
  0x62   : > { %2728 = vmatprep.subr.bf16.mxu0 %v3073_v2 }
  0x65   : > { %2729 = vmatpush3.bf16.msra.mxu0 %v2939_v34 }
  0x66   : > { %2730 = vmatprep.subr.bf16.mxu0 %v3073_v2 }
  0x69   : > { %2731 = vmatpush3.bf16.msra.mxu0 %v2940_v35 }
  0x6a   : > { %2732 = vmatprep.subr.bf16.mxu0 %v3073_v2 }
  0x6d   : > { %2733 = vmatpush3.bf16.msra.mxu0 %v2941_v36 }
  0x6e   : > { %2734 = vmatprep.subr.bf16.mxu0 %v3073_v2 }
  0x71   : > { %2735 = vmatpush3.bf16.msra.mxu0 %v2942_v37 }
  0x72   : > { %2736 = vmatprep.subr.bf16.mxu0 %v3073_v2 }
  0x75   : > { %2737 = vmatpush3.bf16.msra.mxu0 %v2943_v38 }
  0x76   : > { %2738 = vmatprep.subr.bf16.mxu0 %v3073_v2 }
  0x79   : > { %2739 = vmatpush3.bf16.msra.mxu0 %v2944_v39 }
  0x7a   : > { %2768 = vmatprep.subr.bf16.mxu0 %v3073_v2 }
  0x7c   : > { %2741 = vmatmul.mubr.bf16.vlgmr.msra.gmra.mxu0 %v660_v19 }
  0x7d   : > { %2770 = vmatprep.mubr.msk.bf16.mxu0 %vm3074_vm0, %v3073_v2 }
 0x11b   : > { %v877_v21 = vpop.f32.mrf.mxu1 }
 0x11c   : > { %v3352_v23 = vadd.f32 %v2554_v20, %v877_v21  ;;  %v766_v24 = vpop.f32.mrf.mxu0 }
 0x11d   : > { %v2722_v25 = vpop.f32.mrf.mxu1  ;;  %v3358_v26 = vadd.f32 %v2545_v22, %v766_v24 }
 0x11e   : > { %1147 = vrot.lane.b32.xlu1 %v3352_v23, %s3075_s28  ;;  %1141 = vrot.lane.b32.xlu0 %v3352_v23, %s3076_s18  ;;  %v2702_v27 = vpop.f32.mrf.mxu0 }
 0x11f   : > { %v880_v28 = vpop.f32.mrf.mxu1 }
 0x120   : > { %v769_v29 = vpop.f32.mrf.mxu0 }
 0x121   : > { %v2723_v30 = vpop.f32.mrf.mxu1 }
 0x122   : > { %1144 = vrot.lane.b32.xlu0 %v3352_v23, %s3077_s23  ;;  %995 = vrot.lane.b32.xlu1 %v3358_v26, %s3076_s18  ;;  %v2703_v31 = vpop.f32.mrf.mxu0 }
 0x126   : > { %998 = vrot.lane.b32.xlu0 %v3358_v26, %s3077_s23  ;;  %1001 = vrot.lane.b32.xlu1 %v3358_v26, %s3075_s28 }
 0x190   : > { %v1148_v47 = vpop.permute.xlu1 %1147  ;;  %v1142_v48 = vpop.permute.xlu0 %1141 }
 0x191   : > { %v1166_v51 = vcombine.low %v1142_v48, %v1148_v47  ;;  %v1167_v52 = vcombine.high %v1142_v48, %v1148_v47 }
 0x193   : > { %v1174_v58 = vrot.slane %v1166_v51, %v3386_v50  ;;  %v1181_v59 = vrot.slane %v1167_v52, %v3386_v50 }
 0x194   : > { %v1145_v53 = vpop.permute.xlu0 %1144  ;;  %v996_v54 = vpop.permute.xlu1 %995 }
 0x195   : > { %v1150_v55 = vcombine.low %v3352_v23, %v1145_v53  ;;  %v1151_v56 = vcombine.high %v3352_v23, %v1145_v53 }
 0x197   : > { %v1158_v60 = vrot.slane %v1150_v55, %v3386_v50  ;;  %v1165_v61 = vrot.slane %v1151_v56, %v3386_v50 }
 0x198   : > { %v999_v62 = vpop.permute.xlu0 %998  ;;  %v1002_v63 = vpop.permute.xlu1 %1001 }
 0x199   : > { %v1182_v0 = vcombine.low %v1158_v60, %v1174_v58  ;;  %v1183_v1 = vcombine.high %v1158_v60, %v1174_v58  ;;  %v1198_v3 = vcombine.low %v1165_v61, %v1181_v59  ;;  %v1199_v4 = vcombine.high %v1165_v61, %v1181_v59 }
 0x19a   : > { %v1004_v5 = vcombine.low %v3358_v26, %v999_v62  ;;  %v1005_v6 = vcombine.high %v3358_v26, %v999_v62  ;;  %v1020_v7 = vcombine.low %v996_v54, %v1002_v63  ;;  %v1021_v8 = vcombine.high %v996_v54, %v1002_v63 }
 0x19b   : > { %v1190_v9 = vrot.slane %v1182_v0, %v3390_v57  ;;  %v1197_v10 = vrot.slane %v1183_v1, %v3390_v57  ;;  %v1206_v11 = vrot.slane %v1198_v3, %v3390_v57  ;;  %v1213_v12 = vrot.slane %v1199_v4, %v3390_v57 }
 0x19c   : > { %v1012_v13 = vrot.slane %v1004_v5, %v3386_v50  ;;  %v1019_v14 = vrot.slane %v1005_v6, %v3386_v50  ;;  %v1028_v15 = vrot.slane %v1020_v7, %v3386_v50  ;;  %v1035_v16 = vrot.slane %v1021_v8, %v3386_v50 }
 0x19d   : > { %v1218_v18 = vcombine.low %v1190_v9, %v1197_v10  ;;  %v2574_v19 = vcombine.high %v1190_v9, %v1197_v10  ;;  %v1234_v20 = vcombine.low %v1206_v11, %v1213_v12  ;;  %v2575_v21 = vcombine.high %v1206_v11, %v1213_v12 }
 0x19e   : > { %v1036_v22 = vcombine.low %v1012_v13, %v1028_v15  ;;  %v1037_v23 = vcombine.high %v1012_v13, %v1028_v15  ;;  %v1052_v24 = vcombine.low %v1019_v14, %v1035_v16  ;;  %v1053_v25 = vcombine.high %v1019_v14, %v1035_v16 }
 0x19f   : > { %v1225_v26 = vrot.slane %v1218_v18, %v3386_v50  ;;  %v1233_v27 = vrot.slane %v2574_v19, %v3386_v50  ;;  %v1241_v28 = vrot.slane %v1234_v20, %v3386_v50  ;;  %v1249_v29 = vrot.slane %v2575_v21, %v3386_v50  ;;  %v988_v18 = vpop.f32.mrf.mxu0 }
 0x1a0   : > { %v1044_v30 = vrot.slane %v1036_v22, %v3390_v57  ;;  %v1051_v31 = vrot.slane %v1037_v23, %v3390_v57  ;;  %v1060_v32 = vrot.slane %v1052_v24, %v3390_v57  ;;  %v1067_v33 = vrot.slane %v1053_v25, %v3390_v57 }
 0x1a1   : > { %v1250_v34 = vcombine.low %v1225_v26, %v1233_v27  ;;  %v1266_v35 = vcombine.low %v1241_v28, %v1249_v29  ;;  %v1251_v55 = vcombine.high %v1225_v26, %v1233_v27  ;;  %v1267_v56 = vcombine.high %v1241_v28, %v1249_v29  ;;  %v2742_v19 = vpop.f32.mrf.mxu0 }
 0x1a2   : > { %v1072_v36 = vcombine.low %v1044_v30, %v1051_v31  ;;  %v2572_v37 = vcombine.high %v1044_v30, %v1051_v31  ;;  %v1088_v38 = vcombine.low %v1060_v32, %v1067_v33  ;;  %v2573_v39 = vcombine.high %v1060_v32, %v1067_v33 }
 0x1a3   : > { %v1258_v40 = vrot.slane %v1250_v34, %v3390_v57  ;;  %v1274_v41 = vrot.slane %v1266_v35, %v3390_v57  ;;  %v1265_v60 = vrot.slane %v1251_v55, %v3390_v57  ;;  %v1281_v61 = vrot.slane %v1267_v56, %v3390_v57  ;;  %v991_v20 = vpop.f32.mrf.mxu0 }
 0x1a4   : > { %v1079_v42 = vrot.slane %v1072_v36, %v3386_v50  ;;  %v1087_v43 = vrot.slane %v2572_v37, %v3386_v50  ;;  %v1095_v44 = vrot.slane %v1088_v38, %v3386_v50  ;;  %v1103_v45 = vrot.slane %v2573_v39, %v3386_v50 }
 0x1a5   : > { %v1282_v46 = vcombine.low %v1258_v40, %v1274_v41  ;;  %v1283_v54 = vcombine.high %v1258_v40, %v1274_v41  ;;  %v1284_v0 = vcombine.low %v1265_v60, %v1281_v61  ;;  %v1285_v10 = vcombine.high %v1265_v60, %v1281_v61  ;;  %v2743_v21 = vpop.f32.mrf.mxu0  ;;  %v2563_v40 = vld [vmem:[%s3702_s13] ss:$0 sm:$0xff]  ;;  %s3083_s13 = smov [#allocation2]  }
 0x1a6   : > { %v1104_v47 = vcombine.low %v1079_v42, %v1087_v43  ;;  %v1120_v48 = vcombine.low %v1095_v44, %v1103_v45  ;;  %v1105_v1 = vcombine.high %v1079_v42, %v1087_v43  ;;  %v1121_v3 = vcombine.high %v1095_v44, %v1103_v45 }
 0x1a7   : > { %v1436_v49 = vpack.c.bf16 %v1282_v46, %v1282_v46  ;;  %v1437_v59 = vpack.c.bf16 %v1283_v54, %v1283_v54  ;;  %v1438_v5 = vpack.c.bf16 %v1284_v0, %v1284_v0  ;;  %v1439_v12 = vpack.c.bf16 %v1285_v10, %v1285_v10 }
 0x1a8   : > { %v1112_v51 = vrot.slane %v1104_v47, %v3390_v57  ;;  %v1128_v52 = vrot.slane %v1120_v48, %v3390_v57  ;;  %v1119_v7 = vrot.slane %v1105_v1, %v3390_v57  ;;  %v1135_v8 = vrot.slane %v1121_v3, %v3390_v57 }
 0x1a9   : > { %v1445_v53 = vsel %vm1440_vm1, %v1436_v49, 0  ;;  %v1491_v63 = vsel %vm1440_vm1, %v1437_v59, 0  ;;  %v1537_v9 = vsel %vm1440_vm1, %v1438_v5, 0  ;;  %v1583_v14 = vsel %vm1440_vm1, %v1439_v12, 0 }
 0x1aa   : > { %2745 = vmatpush3.bf16.xpose.msra.mxu1 %v1445_v53  ;;  %v1136_v58 = vcombine.low %v1112_v51, %v1128_v52  ;;  %v1137_v4 = vcombine.high %v1112_v51, %v1128_v52  ;;  %v1138_v11 = vcombine.low %v1119_v7, %v1135_v8  ;;  %v1139_v15 = vcombine.high %v1119_v7, %v1135_v8 }
 0x1ab   : > { %2750 = vmatprep.subr.bf16.mxu1 %v3073_v2  ;;  %v989_v43 = vadd.f32 %v2563_v40, %v988_v18 }
 0x1ac   : > { %v1432_v62 = vpack.c.bf16 %v1136_v58, %v1136_v58  ;;  %v1433_v6 = vpack.c.bf16 %v1137_v4, %v1137_v4  ;;  %v1434_v13 = vpack.c.bf16 %v1138_v11, %v1138_v11  ;;  %v1435_v16 = vpack.c.bf16 %v1139_v15, %v1139_v15 }
 0x1b1   : > { %2747 = vmatmul.mubr.msk.bf16.vlgmr.msra.gmra.mxu1 %vm1440_vm1, %v1432_v62 }
 0x1b2   : > { %2751 = vmatpush3.bf16.xpose.msra.mxu1 %v1491_v63  ;;  %2752 = vmatprep.mubr.msk.bf16.mxu1 %vm3074_vm0, %v3073_v2 }
 0x1b3   : > { %2756 = vmatprep.subr.bf16.mxu1 %v3073_v2 }
 0x1b9   : > { %2753 = vmatmul.mubr.msk.bf16.vlgmr.msra.gmra.mxu1 %vm1440_vm1, %v1433_v6 }
 0x1ba   : > { %2757 = vmatpush3.bf16.xpose.msra.mxu1 %v1537_v9  ;;  %2758 = vmatprep.mubr.msk.bf16.mxu1 %vm3074_vm0, %v3073_v2 }
 0x1bb   : > { %2762 = vmatprep.subr.bf16.mxu1 %v3073_v2 }
 0x1c1   : > { %2759 = vmatmul.mubr.msk.bf16.vlgmr.msra.gmra.mxu1 %vm1440_vm1, %v1434_v13 }
 0x1c2   : > { %2763 = vmatpush3.bf16.xpose.msra.mxu1 %v1583_v14  ;;  %2764 = vmatprep.mubr.msk.bf16.mxu1 %vm3074_vm0, %v3073_v2 }
 0x1c3   : > { %2774 = vmatprep.subr.bf16.mxu1 %v3073_v2 }
 0x1c9   : > { %2765 = vmatmul.mubr.msk.bf16.vlgmr.msra.gmra.mxu1 %vm1440_vm1, %v1435_v16 }
 0x1ca   : > { %2776 = vmatprep.mubr.msk.bf16.mxu1 %vm3074_vm0, %v3073_v2 }
 0x271   : > { %v1481_v22 = vpop.f32.mrf.mxu1 }
 0x272   : > { %v1625_v23 = vmul.f32 0.35355338, %v1481_v22 }
 0x273   : > { %v2748_v24 = vpop.f32.mrf.mxu1 }
 0x274   : > { %v1629_v25 = vsel %vm1440_vm1, %v1625_v23, -inf }
 0x275   : > { %1630 = vmax.xlane.f32.xlu0 %v1629_v25  ;;  %v1484_v26 = vpop.f32.mrf.mxu1 }
 0x277   : > { %v2749_v27 = vpop.f32.mrf.mxu1 }
 0x279   : > { %v1527_v28 = vpop.f32.mrf.mxu1 }
 0x27a   : > { %v1626_v29 = vmul.f32 0.35355338, %v1527_v28 }
 0x27b   : > { %v2754_v30 = vpop.f32.mrf.mxu1 }
 0x27c   : > { %v1632_v31 = vsel %vm1440_vm1, %v1626_v29, -inf }
 0x27d   : > { %1633 = vmax.xlane.f32.xlu1 %v1632_v31  ;;  %v1530_v32 = vpop.f32.mrf.mxu1 }
 0x27f   : > { %v2755_v33 = vpop.f32.mrf.mxu1 }
 0x281   : > { %v1573_v34 = vpop.f32.mrf.mxu1 }
 0x282   : > { %v1627_v35 = vmul.f32 0.35355338, %v1573_v34 }
 0x283   : > { %v2760_v36 = vpop.f32.mrf.mxu1 }
 0x284   : > { %v1635_v37 = vsel %vm1440_vm1, %v1627_v35, -inf }
 0x285   : > { %1636 = vmax.xlane.f32.xlu0 %v1635_v37  ;;  %v1576_v38 = vpop.f32.mrf.mxu1 }
 0x287   : > { %v2761_v39 = vpop.f32.mrf.mxu1 }
 0x289   : > { %v1619_v41 = vpop.f32.mrf.mxu1 }
 0x28a   : > { %v1628_v42 = vmul.f32 0.35355338, %v1619_v41 }
 0x28b   : > { %v2766_v44 = vpop.f32.mrf.mxu1 }
 0x28c   : > { %v1638_v45 = vsel %vm1440_vm1, %v1628_v42, -inf }
 0x28d   : > { %1639 = vmax.xlane.f32.xlu0 %v1638_v45  ;;  %v1622_v46 = vpop.f32.mrf.mxu1 }
 0x28e   : > { %1287 = vrot.lane.b32.xlu1 %v989_v43, %s3076_s18 }
 0x28f   : > { %v2767_v47 = vpop.f32.mrf.mxu1 }
 0x2fe   : > { %v1631_v48 = vpop.xlane.xlu0 %1630 }
 0x2ff   : > { %v1641_v49 = vsub.f32 %v1625_v23, %v1631_v48 }
 0x301   : > { %v1645_v51 = vmul.f32 1.442695, %v1641_v49 }
 0x303   : > { %2963 = vpow2.f32 %v1645_v51 }
 0x306   : > { %v1634_v52 = vpop.xlane.xlu1 %1633 }
 0x307   : > { %v1642_v53 = vsub.f32 %v1626_v29, %v1634_v52 }
 0x309   : > { %v1647_v54 = vmul.f32 1.442695, %v1642_v53 }
 0x30a   : > { %v1288_v7 = vpop.permute.xlu1 %1287 }
 0x30b   : > { %2965 = vpow2.f32 %v1647_v54 }
 0x30e   : > { %v1637_v60 = vpop.xlane.xlu0 %1636 }
 0x30f   : > { %v1643_v61 = vsub.f32 %v1627_v35, %v1637_v60 }
 0x310   : > { %v3456_v55 = vpop.eup %2963 }
 0x311   : > { %v1653_v56 = vsel %vm1440_vm1, %v3456_v55, 0.0  ;;  %v1649_v62 = vmul.f32 1.442695, %v1643_v61 }
 0x312   : > { %1654 = vadd.xlane.f32.xlu1 %v1653_v56 }
 0x313   : > { %2967 = vpow2.f32 %v1649_v62 }
 0x316   : > { %v1640_v63 = vpop.xlane.xlu0 %1639 }
 0x317   : > { %v1644_v0 = vsub.f32 %v1628_v42, %v1640_v63 }
 0x318   : > { %v3460_v58 = vpop.eup %2965 }
 0x319   : > { %v1656_v59 = vsel %vm1440_vm1, %v3460_v58, 0.0  ;;  %v1651_v1 = vmul.f32 1.442695, %v1644_v0 }
 0x31a   : > { %1657 = vadd.xlane.f32.xlu0 %v1656_v59 }
 0x31b   : > { %2969 = vpow2.f32 %v1651_v1 }
 0x320   : > { %v3466_v3 = vpop.eup %2967 }
 0x321   : > { %v1659_v4 = vsel %vm1440_vm1, %v3466_v3, 0.0 }
 0x323   : > { %1293 = vrot.lane.b32.xlu1 %v989_v43, %s3075_s28  ;;  %s2329_s28 = sshll.u32 %s3291_s25, 4  ;;  %s3590_s28 = int_to_ptr.vmem [resolvable:$true] %s2329_s28 }
 0x324   : > { %s2979_s16 = scalar_lea.vmem %s3590_s28, 128 }
 0x325   : > { %p2980_p1 = scmp.ne.s32.totalorder %s3590_s28, %s2979_s16 }
 0x327   : > { %p2981_p2 = pnand %p2980_p1, %p3203_p3 }
 0x328   : > { %v3470_v5 = vpop.eup %2969 }
 0x329   : > { %v1662_v6 = vsel %vm1440_vm1, %v3470_v5, 0.0  ;;  %p2982_p4 = pneg %p2981_p2 }
 0x330   : > { %1290 = vrot.lane.b32.xlu0 %v989_v43, %s3077_s23  ;;  %s3706_s23 = sld [smem:[#allocation23_spill]] }
 0x336   : > { %s3588_s0 = scalar_lea.hbm %s3706_s23, %s2611_s19 }
 0x347   : > { %1660 = vadd.xlane.f32.xlu1 %v1659_v4 }
 0x34f   : > { %1663 = vadd.xlane.f32.xlu0 %v1662_v6 }
 0x39b   : > { %v1655_v8 = vpop.xlane.xlu1 %1654 }
 0x39c   : > { %2971 = vrcp.f32 %v1655_v8 }
 0x39f   : > { %v1294_v9 = vpop.permute.xlu1 %1293 }
 0x3a0   : > { %v1312_v11 = vcombine.low %v1288_v7, %v1294_v9  ;;  %v1313_v12 = vcombine.high %v1288_v7, %v1294_v9 }
 0x3a2   : > { %v1320_v16 = vrot.slane %v1312_v11, %v3386_v50  ;;  %v1327_v18 = vrot.slane %v1313_v12, %v3386_v50 }
 0x3a3   : > { %v1658_v10 = vpop.xlane.xlu0 %1657 }
 0x3a4   : > { %2973 = vrcp.f32 %v1658_v10 }
 0x3a7   : > { %v1291_v13 = vpop.permute.xlu0 %1290 }
 0x3a8   : > { %v1296_v14 = vcombine.low %v989_v43, %v1291_v13  ;;  %v1297_v15 = vcombine.high %v989_v43, %v1291_v13 }
 0x3a9   : > { %v2972_v41 = vpop.eup %2971 }
 0x3aa   : > { %v1304_v19 = vrot.slane %v1296_v14, %v3386_v50  ;;  %v1311_v20 = vrot.slane %v1297_v15, %v3386_v50  ;;  %v1669_v54 = vmul.f32 %v2972_v41, %v3456_v55 }
 0x3ac   : > { %v1328_v21 = vcombine.low %v1304_v19, %v1320_v16  ;;  %v1329_v22 = vcombine.high %v1304_v19, %v1320_v16  ;;  %v1344_v23 = vcombine.low %v1311_v20, %v1327_v18  ;;  %v1345_v24 = vcombine.high %v1311_v20, %v1327_v18 }
 0x3ad   : > { %v1673_v63 = vpack.c.bf16 %v1669_v54, %v1669_v54 }
 0x3ae   : > { %v1336_v25 = vrot.slane %v1328_v21, %v3390_v57  ;;  %v1343_v26 = vrot.slane %v1329_v22, %v3390_v57  ;;  %v1352_v27 = vrot.slane %v1344_v23, %v3390_v57  ;;  %v1359_v28 = vrot.slane %v1345_v24, %v3390_v57 }
 0x3b0   : > { %v1364_v29 = vcombine.low %v1336_v25, %v1343_v26  ;;  %v2576_v30 = vcombine.high %v1336_v25, %v1343_v26  ;;  %v1380_v31 = vcombine.low %v1352_v27, %v1359_v28  ;;  %v2577_v32 = vcombine.high %v1352_v27, %v1359_v28 }
 0x3b1   : > { %v2974_v46 = vpop.eup %2973 }
 0x3b2   : > { %v1371_v33 = vrot.slane %v1364_v29, %v3386_v50  ;;  %v1379_v34 = vrot.slane %v2576_v30, %v3386_v50  ;;  %v1387_v35 = vrot.slane %v1380_v31, %v3386_v50  ;;  %v1395_v36 = vrot.slane %v2577_v32, %v3386_v50 }
 0x3b3   : > { %v1670_v56 = vmul.f32 %v2974_v46, %v3460_v58 }
 0x3b4   : > { %v1396_v37 = vcombine.low %v1371_v33, %v1379_v34  ;;  %v1412_v38 = vcombine.low %v1387_v35, %v1395_v36  ;;  %v1397_v39 = vcombine.high %v1371_v33, %v1379_v34  ;;  %v1413_v40 = vcombine.high %v1387_v35, %v1395_v36 }
 0x3b5   : > { %v1674_v0 = vpack.c.bf16 %v1670_v56, %v1670_v56 }
 0x3b6   : > { %v1404_v42 = vrot.slane %v1396_v37, %v3390_v57  ;;  %v1420_v43 = vrot.slane %v1412_v38, %v3390_v57  ;;  %v1411_v44 = vrot.slane %v1397_v39, %v3390_v57  ;;  %v1427_v45 = vrot.slane %v1413_v40, %v3390_v57  ;;  %v2945_v38 = vld [vmem:[%s3271_s2 + $0x8] sm:$0xff]  }
 0x3b8   : > { %v1428_v47 = vcombine.low %v1404_v42, %v1420_v43  ;;  %v1429_v48 = vcombine.high %v1404_v42, %v1420_v43  ;;  %v1430_v49 = vcombine.low %v1411_v44, %v1427_v45  ;;  %v1431_v51 = vcombine.high %v1411_v44, %v1427_v45 }
 0x3ba   : > { %v1677_v52 = vpack.c.bf16 %v1428_v47, %v1428_v47  ;;  %v1678_v53 = vpack.c.bf16 %v1429_v48, %v1429_v48  ;;  %v1679_v61 = vpack.c.bf16 %v1430_v49, %v1430_v49  ;;  %v1680_v62 = vpack.c.bf16 %v1431_v51, %v1431_v51  ;;  %v2946_v48 = vld [vmem:[%s3271_s2] sm:$0xff]   ;;  %s3080_s2 = smov 16  }
 0x3bc   : > { %v1686_v59 = vsel %vm1684_vm2, %v1677_v52, 0  ;;  %v1732_v60 = vsel %vm1684_vm2, %v1678_v53, 0  ;;  %v1778_v55 = vsel %vm1684_vm2, %v1679_v61, 0  ;;  %v1824_v58 = vsel %vm1684_vm2, %v1680_v62, 0  ;;  %v2947_v61 = vld [vmem:[%s3276_s22 + $0x38] sm:$0xff]  }
 0x3bd   : > { %2769 = vmatpush3.bf16.msra.mxu0 %v1686_v59  ;;  %2775 = vmatpush3.bf16.msra.mxu1 %v1732_v60 }
 0x3be   : > { %2780 = vmatprep.subr.bf16.mxu0 %v3073_v2  ;;  %2786 = vmatprep.subr.bf16.mxu1 %v3073_v2 }
 0x3c0   : > { %2771 = vmatmul.mubr.msk.bf16.vlgmr.msra.gmra.mxu0 %vm1440_vm1, %v1673_v63  ;;  %2777 = vmatmul.mubr.msk.bf16.vlgmr.msra.gmra.mxu1 %vm1440_vm1, %v1674_v0 }
 0x3c1   : > { %2781 = vmatpush3.bf16.msra.mxu0 %v1778_v55  ;;  %2787 = vmatpush3.bf16.msra.mxu1 %v1824_v58 }
 0x3c2   : > { %2782 = vmatprep.mubr.msk.bf16.mxu0 %vm3074_vm0, %v3073_v2  ;;  %2788 = vmatprep.mubr.msk.bf16.mxu1 %vm3074_vm0, %v3073_v2 }
 0x3c3   : > { %2792 = vmatprep.subr.bf16.mxu0 %v3073_v2  ;;  %2800 = vmatprep.subr.bf16.mxu1 %v3073_v2 }
 0x3d0   : > { %v1661_v1 = vpop.xlane.xlu1 %1660 }
 0x3d1   : > { %2975 = vrcp.f32 %v1661_v1 }
 0x3d8   : > { %v1664_v4 = vpop.xlane.xlu0 %1663 }
 0x3d9   : > { %2977 = vrcp.f32 %v1664_v4 }
 0x3de   : > { %v2976_v6 = vpop.eup %2975 }
 0x3df   : > { %v1671_v7 = vmul.f32 %v2976_v6, %v3466_v3  ;;  %v2949_v6 = vld [vmem:[%s3276_s22 + $0x28] sm:$0xff]  }
 0x3e1   : > { %v1675_v8 = vpack.c.bf16 %v1671_v7, %v1671_v7 }
 0x3e3   : > { %2783 = vmatmul.mubr.msk.bf16.vlgmr.msra.gmra.mxu0 %vm1440_vm1, %v1675_v8  ;;  %v2951_v8 = vld [vmem:[%s3276_s22 + $0x18] sm:$0xff]  }
 0x3e4   : > { %2796 = vmatprep.mubr.msk.bf16.mxu0 %vm3074_vm0, %v3073_v2  ;;  %2793 = vmatpush3.bf16.msra.mxu0 %v2945_v38 }
 0x3e5   : > { %2794 = vmatprep.subr.bf16.mxu0 %v3073_v2 }
 0x3e6   : > { %v2978_v9 = vpop.eup %2977 }
 0x3e7   : > { %v1672_v10 = vmul.f32 %v2978_v9, %v3470_v5  ;;  %v2952_v9 = vld [vmem:[%s3276_s22 + $0x10] sm:$0xff]  }
 0x3e8   : > { %2795 = vmatpush3.bf16.msra.mxu0 %v2946_v48 }
 0x3e9   : > { %v1676_v11 = vpack.c.bf16 %v1672_v10, %v1672_v10  ;;  %2820 = vmatprep.subr.bf16.mxu0 %v3073_v2 }
 0x3eb   : > { %2789 = vmatmul.mubr.msk.bf16.vlgmr.msra.gmra.mxu1 %vm1440_vm1, %v1676_v11 }
 0x3ec   : > { %2816 = vmatprep.mubr.msk.bf16.mxu1 %vm3074_vm0, %v3073_v2  ;;  %2801 = vmatpush3.bf16.msra.mxu1 %v2947_v61 }
 0x3ed   : > { %2802 = vmatprep.subr.bf16.mxu1 %v3073_v2 }
 0x480   : > { %v1722_v12 = vpop.f32.mrf.mxu0  ;;  %v1768_v13 = vpop.f32.mrf.mxu1 }
 0x482   : > { %v2772_v14 = vpop.f32.mrf.mxu0  ;;  %v2778_v15 = vpop.f32.mrf.mxu1 }
 0x484   : > { %v1725_v3 = vpop.f32.mrf.mxu0  ;;  %v1771_v16 = vpop.f32.mrf.mxu1 }
 0x485   : > { %v2953_v16 = vld [vmem:[%s3276_s22 + $0x8] sm:$0xff]  }
 0x486   : > { %v2773_v18 = vpop.f32.mrf.mxu0  ;;  %v2779_v19 = vpop.f32.mrf.mxu1 }
 0x487   : > { %v2954_v18 = vld [vmem:[%s3276_s22] sm:$0xff]   ;;  %v2955_v19 = vld [vmem:[%s3285_s5 + $0x38] sm:$0xff]  }
 0x4a3   : > { %v1814_v20 = vpop.f32.mrf.mxu0 }
 0x4a4   : > { %v1866_v5 = vcombine.low %v1722_v12, %v1814_v20  ;;  %v1867_v24 = vcombine.high %v1722_v12, %v1814_v20  ;;  %v2956_v20 = vld [vmem:[%s3285_s5 + $0x30] sm:$0xff]  }
 0x4a5   : > { %v2784_v21 = vpop.f32.mrf.mxu0 }
 0x4a6   : > { %v1874_v29 = vrot.slane %v1866_v5, %v3386_v50  ;;  %v1881_v30 = vrot.slane %v1867_v24, %v3386_v50  ;;  %v2957_v21 = vld [vmem:[%s3285_s5 + $0x28] sm:$0xff]   ;;  %v2960_v5 = vld [vmem:[%s3285_s5 + $0x10] sm:$0xff]   ;;  %v2588_v24 = vld [vmem:[%s635_s26] ss:$0 sm:$0xff] }
 0x4a7   : > { %v1817_v22 = vpop.f32.mrf.mxu0 }
 0x4a8   : > { %v2958_v22 = vld [vmem:[%s3285_s5 + $0x20] sm:$0xff]  }
 0x4a9   : > { %v2785_v23 = vpop.f32.mrf.mxu0 }
 0x4aa   : > { %v2959_v23 = vld [vmem:[%s3285_s5 + $0x18] sm:$0xff]  }
 0x4ab   : > { %v1860_v25 = vpop.f32.mrf.mxu1 }
 0x4ac   : > { %v1882_v26 = vcombine.low %v1768_v13, %v1860_v25  ;;  %v1883_v27 = vcombine.high %v1768_v13, %v1860_v25 }
 0x4ad   : > { %v2790_v28 = vpop.f32.mrf.mxu1 }
 0x4ae   : > { %v1890_v31 = vrot.slane %v1882_v26, %v3386_v50  ;;  %v1897_v32 = vrot.slane %v1883_v27, %v3386_v50 }
 0x4af   : > { %v1863_v33 = vpop.f32.mrf.mxu1 }
 0x4b0   : > { %v1898_v34 = vcombine.low %v1874_v29, %v1890_v31  ;;  %v1899_v35 = vcombine.high %v1874_v29, %v1890_v31  ;;  %v1914_v36 = vcombine.low %v1881_v30, %v1897_v32  ;;  %v1915_v37 = vcombine.high %v1881_v30, %v1897_v32  ;;  %v2961_v32 = vld [vmem:[%s3285_s5 + $0x8] sm:$0xff]   ;;  %v2962_v33 = vld [vmem:[%s3285_s5] sm:$0xff]  }
 0x4b1   : > { %v2791_v39 = vpop.f32.mrf.mxu1 }
 0x4b2   : > { %v1906_v40 = vrot.slane %v1898_v34, %v3390_v57  ;;  %v1913_v41 = vrot.slane %v1899_v35, %v3390_v57  ;;  %v1922_v42 = vrot.slane %v1914_v36, %v3390_v57  ;;  %v1929_v43 = vrot.slane %v1915_v37, %v3390_v57  ;;  %v2592_v34 = vld [vmem:[%s643_s27] ss:$0 sm:$0xff] }
 0x4b4   : > { %v1934_v44 = vcombine.low %v1906_v40, %v1913_v41  ;;  %v2586_v45 = vcombine.high %v1906_v40, %v1913_v41  ;;  %v1950_v46 = vcombine.low %v1922_v42, %v1929_v43  ;;  %v2587_v47 = vcombine.high %v1922_v42, %v1929_v43 }
 0x4b6   : > { %v1941_v49 = vrot.slane %v1934_v44, %v3386_v50  ;;  %v1949_v51 = vrot.slane %v2586_v45, %v3386_v50  ;;  %v1957_v52 = vrot.slane %v1950_v46, %v3386_v50  ;;  %v1965_v53 = vrot.slane %v2587_v47, %v3386_v50  ;;  %v2948_v50 = vld [vmem:[%s3276_s22 + $0x30] sm:$0xff]  }
 0x4b7   : > { %2803 = vmatpush3.bf16.msra.mxu1 %v2948_v50 }
 0x4b8   : > { %v1967_v54 = vcombine.high %v1941_v49, %v1949_v51  ;;  %v1983_v56 = vcombine.high %v1957_v52, %v1965_v53  ;;  %v1966_v59 = vcombine.low %v1941_v49, %v1949_v51  ;;  %v1982_v60 = vcombine.low %v1957_v52, %v1965_v53  ;;  %2804 = vmatprep.subr.bf16.mxu1 %v3073_v2 }
 0x4ba   : > { %v1981_v62 = vrot.slane %v1967_v54, %v3390_v57  ;;  %v1997_v63 = vrot.slane %v1983_v56, %v3390_v57  ;;  %v1974_v0 = vrot.slane %v1966_v59, %v3390_v57  ;;  %v1990_v55 = vrot.slane %v1982_v60, %v3390_v57  ;;  %v2950_v57 = vld [vmem:[%s3276_s22 + $0x20] sm:$0xff]  }
 0x4bb   : > { %2805 = vmatpush3.bf16.msra.mxu1 %v2949_v6 }
 0x4bc   : > { %v2000_v58 = vcombine.low %v1981_v62, %v1997_v63  ;;  %v1999_v1 = vcombine.high %v1974_v0, %v1990_v55  ;;  %v1998_v4 = vcombine.low %v1974_v0, %v1990_v55  ;;  %v2001_v7 = vcombine.high %v1981_v62, %v1997_v63  ;;  %2806 = vmatprep.subr.bf16.mxu1 %v3073_v2 }
 0x4be   : > { %2007 = vrot.lane.b32.xlu1 %v2000_v58, %s3080_s2  ;;  %2003 = vrot.lane.b32.xlu0 %v1999_v1, %s3081_s15  ;;  %s2983_s2 = sshll.u32 %s3083_s13, 4  ;;  %s2984_s2 = int_to_ptr.vmem [resolvable:$false] %s2983_s2 }
 0x4bf   : > { %2807 = vmatpush3.bf16.msra.mxu1 %v2950_v57  ;;  %s2985_s15 = scalar_lea.vmem %s2984_s2, 256  ;;  %p2986_p5 = scmp.lt.s32.totalorder %s3590_s28, %s2984_s2 }
 0x4c0   : > { %2808 = vmatprep.subr.bf16.mxu1 %v3073_v2  ;;  %p2987_p6 = scmp.lt.s32.totalorder %s2985_s15, %s2979_s16 }
 0x4c2   : > { %2011 = vrot.lane.b32.xlu1 %v2001_v7, %s3082_s20  ;;  %p2988_p7 = por %p2987_p6, %p2986_p5 }
 0x4c3   : > { %2809 = vmatpush3.bf16.msra.mxu1 %v2951_v8 }
 0x4c4   : > { %2810 = vmatprep.subr.bf16.mxu1 %v3073_v2  ;;  %p2989_p8 = pnand %p2988_p7, %p2982_p4 }
 0x4c7   : > { %2811 = vmatpush3.bf16.msra.mxu1 %v2952_v9 }
 0x4c8   : > { %2812 = vmatprep.subr.bf16.mxu1 %v3073_v2 }
 0x4cb   : > { %2813 = vmatpush3.bf16.msra.mxu1 %v2953_v16 }
 0x4cc   : > { %2814 = vmatprep.subr.bf16.mxu1 %v3073_v2 }
 0x4cf   : > { %2815 = vmatpush3.bf16.msra.mxu1 %v2954_v18 }
 0x530   : > { %v2008_v10 = vpop.permute.xlu1 %2007  ;;  %v2004_v11 = vpop.permute.xlu0 %2003 }
 0x531   : > { %v2014_v12 = vsel %vm1440_vm1, %v1998_v4, %v2004_v11 }
 0x532   : > { %v2016_v14 = vsel %vm2015_vm3, %v2014_v12, %v2008_v10 }
 0x534   : > { %v2012_v13 = vpop.permute.xlu1 %2011 }
 0x535   : > { %v2018_v15 = vsel %vm2017_vm4, %v2016_v14, %v2012_v13 }
 0x536   : > { %v2019_v3 = vpack.c.bf16 %v2018_v15, %v2018_v15 }
 0x538   : > { %2797 = vmatmul.mubr.msk.bf16.vlgmr.msra.gmra.mxu0 %vm2043_vm5, %v2019_v3 }
 0x539   : > { %2836 = vmatprep.mubr.msk.bf16.mxu0 %vm3074_vm0, %v3073_v2  ;;  %2821 = vmatpush3.bf16.msra.mxu0 %v2955_v19 }
 0x53a   : > { %2822 = vmatprep.subr.bf16.mxu0 %v3073_v2 }
 0x53d   : > { %2823 = vmatpush3.bf16.msra.mxu0 %v2956_v20 }
 0x53e   : > { %2824 = vmatprep.subr.bf16.mxu0 %v3073_v2 }
 0x541   : > { %2825 = vmatpush3.bf16.msra.mxu0 %v2957_v21 }
 0x542   : > { %2826 = vmatprep.subr.bf16.mxu0 %v3073_v2 }
 0x545   : > { %2827 = vmatpush3.bf16.msra.mxu0 %v2958_v22 }
 0x546   : > { %2828 = vmatprep.subr.bf16.mxu0 %v3073_v2 }
 0x549   : > { %2829 = vmatpush3.bf16.msra.mxu0 %v2959_v23 }
 0x54a   : > { %2830 = vmatprep.subr.bf16.mxu0 %v3073_v2 }
 0x54d   : > { %2831 = vmatpush3.bf16.msra.mxu0 %v2960_v5 }
 0x54e   : > { %2832 = vmatprep.subr.bf16.mxu0 %v3073_v2 }
 0x551   : > { %2833 = vmatpush3.bf16.msra.mxu0 %v2961_v32 }
 0x552   : > { %2834 = vmatprep.subr.bf16.mxu0 %v3073_v2  ;;  %v2601_v2 = vld [vmem:[%s651_s3] ss:$0 sm:$0xff]  ;;  %s2316_s3 = scalar_lea.sflag [#allocation3], %s3707_s30 }
 0x555   : > { %2835 = vmatpush3.bf16.msra.mxu0 %v2962_v33 }
 0x5f8   : > { %v2081_v25 = vpop.f32.mrf.mxu0 }
 0x5f9   : > { %v2082_v26 = vadd.f32 %v2588_v24, %v2081_v25 }
 0x5fa   : > { %v2798_v27 = vpop.f32.mrf.mxu0 }
 0x5fb   : > { %v2087_v28 = vadd.f32 %v2082_v26, %v3329_v17 }
 0x5fc   : > { %v2084_v29 = vpop.f32.mrf.mxu0 }
 0x5fd   : > { %v2088_v30 = vpack.c.bf16 %v2087_v28, %v2087_v28 }
 0x5fe   : > { %v2799_v31 = vpop.f32.mrf.mxu0 }
 0x5ff   : > { %2817 = vmatmul.mubr.bf16.vlgmr.msra.gmra.mxu1 %v2088_v30 }
 0x6bf   : > { %v2194_v35 = vpop.f32.mrf.mxu1 }
 0x6c0   : > { %v2195_v17 = vadd.f32 %v2592_v34, %v2194_v35 }
 0x6c1   : > { %v2818_v36 = vpop.f32.mrf.mxu1 }
 0x6c2   : > { %v2200_v37 = vmax.f32 %v2195_v17, 0.0 }
 0x6c3   : > { %v2197_v38 = vpop.f32.mrf.mxu1 }
 0x6c4   : > { %v2201_v39 = vpack.c.bf16 %v2200_v37, %v2200_v37 }
 0x6c5   : > { %v2819_v40 = vpop.f32.mrf.mxu1 }
 0x6c6   : > { %2837 = vmatmul.mubr.bf16.vlgmr.msra.gmra.mxu0 %v2201_v39 }
 0x786   : > { %v2307_v41 = vpop.f32.mrf.mxu0 }
 0x787   : > { %v2308_v42 = vadd.f32 %v2601_v2, %v2307_v41 }
 0x788   : > { %v2838_v43 = vpop.f32.mrf.mxu0 }
 0x789   : > { %v2313_v44 = vadd.f32 %v2308_v42, %v2087_v28 }
 0x78a   : > { %v2310_v45 = vpop.f32.mrf.mxu0 }
 0x78b   : > { %2314 = vst [vmem:[%s3291_s25] sm:$0xff] %v2313_v44 }
 0x78c   : > { %v2839_v46 = vpop.f32.mrf.mxu0 }
 0x78d   : > { %2992 = shalt.err (!%p2989_p8)
}
 0x78e   : > { %s2993_s25 = scalar_lea.hbm %s3588_s0, 128  ;;  %s2997_s1 = scalar_lea.hbm %s3706_s23, 256 }
 0x78f   : > { %p2994_p10 = scmp.ne.s32.totalorder %s3588_s0, %s2993_s25  ;;  %p2998_p13 = scmp.lt.s32.totalorder %s3588_s0, %s3706_s23 }
 0x790   : > { %p2999_p0 = scmp.lt.s32.totalorder %s2997_s1, %s2993_s25 }
 0x791   : > { %p2995_p11 = pnand %p2994_p10, %p3203_p3 }
 0x792   : > { %p3000_p1 = por %p2999_p0, %p2998_p13 }
 0x793   : > { %p2996_p12 = pneg %p2995_p11 }
 0x795   : > { %p3001_p2 = pnand %p3000_p1, %p2996_p12 }
 0x797   : > { %3004 = shalt.err (!%p3001_p2)
}
 0x798   : > { %2840 = dma.vmem_to_hbm [thread:$0]  (%p3203_p3), %s3590_s28, 128, %s3588_s0, %s2316_s3  }
 0x799 PF: > { %s3708_s26 = sld [smem:[#allocation12_spill]] }
 0x79a   : > { %s3709_s21 = sld [smem:[#allocation5_spill]] }
 0x79f   : > { %p2846_p4 = scmp.ge.s32.totalorder %s3708_s26, 2 }
 0x7a0   : > { %s2341_s17 = sand.u32 1, %s3709_s21  }
 0x7a1   : > { %p2843_p5 = pnand %p2846_p4, %p3213_p9  ;;  %s2342_s19 = scalar_lea.sflag [#allocation3], %s2341_s17 }
 0x7a3   : > { %p2844_p6 = pneg %p2843_p5 }
 0x7a5   : > { %3038 = dma.done.wait (%p2844_p6), %s2342_s19, 128  }
 0x7a6   : > { %3040 = vsyncadd (%p2844_p6), %s2342_s19, 4294967168  ;;  %s26_s15 = sadd.s32 1, %s3708_s26   ;;  %s3711_s25 = sld [smem:[#allocation6_spill]] }
 0x7a7   : > { %p23_p7 = scmp.ge.s32.totalorder %s26_s15, 6   ;;  %s3712_s26 = sld [smem:[#allocation7_spill]] }
 0x7a8   : > { %s3713_s27 = sld [smem:[#allocation17_spill]] }
 0x7a9   : > { %s3714_s28 = sld [smem:[#allocation10_spill]]  ;;  %25 = sbr.rel (!%p23_p7) target bundleno = 12 (0xc), region = 147 }
 0x7aa   : > { %s3715_s29 = sld [smem:[#allocation11_spill]] }
 0x7ab   : > { %s3716_s30 = sld [smem:[#allocation13_spill]] }
 0x7ac   : > { %s3717_s14 = sld [smem:[#allocation15_spill]] }
 0x7ae   :  { %2347 = vsyncpa [#allocation3], 1 }
 0x7af   :  { %2349 = vsyncpa [#allocation3 + $0x1], 1 }

</bundles_post_ra>
